<compile_context>
chip_gen: v7x
topology: tpu7x:2x2x1
jax: 0.10.0
libtpu: 0.0.40
codegen_flags: <defaults>
</compile_context>

<pallas_src>
import jax
import jax.numpy as jnp
from jax.experimental import pallas as pl
from jax.experimental.pallas import tpu as pltpu


def _prim_kernel(f_ref, w_ref, b_ref, o_ref):
    # f_ref: (tb, C)     feature tile
    # w_ref: (C, R*4)    all R head weights fused along the lane axis
    # b_ref: (1, R*4)    all R head biases as one row
    # o_ref: (tb, R*4)   lane-dense fused output tile
    x = jnp.dot(f_ref[...], w_ref[...], preferred_element_type=jnp.float32)
    o_ref[...] = (x + b_ref[...]).astype(o_ref.dtype)


def primitive_module_forward(feature, weights, biases, *, max_tb=512):
    """feature: (B, C); weights: (R, C, 4); biases: (R, 4) -> (R, B, 4)."""
    B, C = feature.shape
    R, _, F = weights.shape
    N = R * F

    # Fuse the R heads along the output (lane) axis: column block r holds head r.
    w2d = jnp.transpose(weights, (1, 0, 2)).reshape(C, N)  # (C, R*4)
    b2d = biases.reshape(1, N)                             # (1, R*4)

    # Batch tiling: single block for small B; (tb, C) tiles pipelined over a
    # 1-D grid when B is large and cleanly divisible (tb multiple of 8).
    if B > max_tb and B % max_tb == 0:
        tb = max_tb
    else:
        tb = B
    grid = (B // tb,)

    out2d = pl.pallas_call(
        _prim_kernel,
        out_shape=jax.ShapeDtypeStruct((B, N), feature.dtype),
        grid_spec=pltpu.PrefetchScalarGridSpec(
            num_scalar_prefetch=0,
            grid=grid,
            in_specs=[
                pl.BlockSpec((tb, C), lambda i: (i, 0)),  # feature tile
                pl.BlockSpec((C, N), lambda i: (0, 0)),   # fused weights (resident)
                pl.BlockSpec((1, N), lambda i: (0, 0)),   # fused bias    (resident)
            ],
            out_specs=pl.BlockSpec((tb, N), lambda i: (i, 0)),
        ),
        compiler_params=pltpu.CompilerParams(
            dimension_semantics=("parallel",),
        ),
    )(feature, w2d, b2d)

    # (B, R*4) -> (R, B, 4), matching torch.stack over the per-head outputs.
    return jnp.transpose(out2d.reshape(B, R, F), (1, 0, 2))


if __name__ == "__main__":
    # prim_dict = {'Rectangles': 3, 'Triangles': 2, 'Circles': 1}; outChannels = 32.
    # Only the rectangle heads are used in forward (rect_count Linear(C->4) layers).
    R = 3          # rect_count
    B = 8          # batch
    C = 32         # outChannels

    key = jax.random.PRNGKey(0)
    kf, kw, kb = jax.random.split(key, 3)

    feature = jax.random.normal(kf, (B, C), dtype=jnp.float32)
    # Deterministic per-head Linear params (synthetic init, torch-default-like scale).
    bound = 1.0 / jnp.sqrt(jnp.float32(C))
    weights = jax.random.uniform(kw, (R, C, 4), dtype=jnp.float32, minval=-bound, maxval=bound)
    biases = jax.random.uniform(kb, (R, 4), dtype=jnp.float32, minval=-bound, maxval=bound)

    out = primitive_module_forward(feature, weights, biases)
    out = jax.block_until_ready(out)

    # Pure-JAX reference (same math as PyTorch: feature @ W_r^T-equivalent + b_r, stacked).
    ref = jnp.einsum("bc,rcf->rbf", feature, weights) + biases[:, None, :]
    assert out.shape == (R, B, 4)
    assert jnp.allclose(out, ref, atol=1e-5, rtol=1e-5)

    print("KERNEL_OK")
</pallas_src>

<mosaic_0001>
module attributes {stable_mosaic.version = 11 : i64} {
  func.func @_prim_kernel(%arg0: i32, %arg1: memref<8x32xf32, #tpu.memory_space<vmem>>, %arg2: memref<32x12xf32, #tpu.memory_space<vmem>>, %arg3: memref<1x12xf32, #tpu.memory_space<vmem>>, %arg4: memref<8x12xf32, #tpu.memory_space<vmem>>) attributes {dimension_semantics = [#tpu.dimension_semantics<parallel>], iteration_bounds = array<i64: 1>, scalar_prefetch = 0 : i64, scratch_operands = 0 : i64, tpu.core_type = #tpu.core_type<tc>, window_params = [{transform_indices = @transform_0, window_bounds = array<i64: 8, 32>}, {pipeline_mode = #tpu.pipeline_mode<synchronous>, transform_indices = @transform_1, window_bounds = array<i64: 32, 12>}, {pipeline_mode = #tpu.pipeline_mode<synchronous>, transform_indices = @transform_2, window_bounds = array<i64: 1, 12>}, {transform_indices = @transform_3, window_bounds = array<i64: 8, 12>}]} {
    %c0 = arith.constant 0 : index
    %c0_0 = arith.constant 0 : index
    %0 = vector.load %arg1[%c0, %c0_0] : memref<8x32xf32, #tpu.memory_space<vmem>>, vector<8x32xf32>
    %c0_1 = arith.constant 0 : index
    %c0_2 = arith.constant 0 : index
    %1 = vector.load %arg2[%c0_1, %c0_2] : memref<32x12xf32, #tpu.memory_space<vmem>>, vector<32x12xf32>
    %cst = arith.constant dense<0.000000e+00> : vector<8x12xf32>
    %2 = tpu.matmul %0, %1, %cst {dimension_numbers = #tpu.dot_dimension_numbers<[1], [0], [0], [1], [0, 0, 1, 1], [], []>} : vector<8x32xf32>, vector<32x12xf32>, vector<8x12xf32> -> vector<8x12xf32>
    %c0_3 = arith.constant 0 : index
    %c0_4 = arith.constant 0 : index
    %3 = vector.load %arg3[%c0_3, %c0_4] : memref<1x12xf32, #tpu.memory_space<vmem>>, vector<1x12xf32>
    %4 = vector.broadcast %3 : vector<1x12xf32> to vector<8x12xf32>
    %5 = arith.addf %2, %4 : vector<8x12xf32>
    %c0_5 = arith.constant 0 : index
    %c0_6 = arith.constant 0 : index
    %6 = vector.load %arg4[%c0_5, %c0_6] : memref<8x12xf32, #tpu.memory_space<vmem>>, vector<8x12xf32>
    tpu.vector_store %arg4[%c0_5, %c0_6], %5 {strides = array<i32>} : memref<8x12xf32, #tpu.memory_space<vmem>>, vector<8x12xf32>,
    return
  }
  func.func @transform_0(%arg0: i32) -> (i32, i32) {
    %c0_i32 = arith.constant 0 : i32
    %c0_i32_0 = arith.constant 0 : i32
    return %arg0, %c0_i32 : i32, i32
  }
  func.func @transform_1(%arg0: i32) -> (i32, i32) {
    %c0_i32 = arith.constant 0 : i32
    %c0_i32_0 = arith.constant 0 : i32
    %c0_i32_1 = arith.constant 0 : i32
    return %c0_i32, %c0_i32_0 : i32, i32
  }
  func.func @transform_2(%arg0: i32) -> (i32, i32) {
    %c0_i32 = arith.constant 0 : i32
    %c0_i32_0 = arith.constant 0 : i32
    %c0_i32_1 = arith.constant 0 : i32
    return %c0_i32, %c0_i32_0 : i32, i32
  }
  func.func @transform_3(%arg0: i32) -> (i32, i32) {
    %c0_i32 = arith.constant 0 : i32
    %c0_i32_0 = arith.constant 0 : i32
    return %arg0, %c0_i32 : i32, i32
  }
}

</mosaic_0001>

<bundles_post_ra>
// kernel: tpu_custom_call.1
= control target key start
LH: loop header
LB: loop body
LE: loop exit
PB: predicated region body
PF: predicated region fallthrough
CT: control target
= control target key end

     0   :  { %v169_v3 = vmov 0.0|0.0   ;;  %vm170_vm0 = vmmov 0   ;;  %v171_v6 = vmov 0.0   ;;  %s223_s0 = inlined_call_operand.vmem [shape: f32[8,32], index: 0, kind: input, shape index: {}]   ;;  %s224_s1 = inlined_call_operand.vmem [shape: f32[32,12], index: 1, kind: input, shape index: {}]   ;;  %s225_s2 = inlined_call_operand.vmem [shape: f32[1,12], index: 2, kind: input, shape index: {}]   ;;  %s226_s3 = inlined_call_operand.hbm [shape: f32[8,12], index: 3, kind: output, shape index: {}]  }
   0x1   :  { %v16_v0 = vld [vmem:[%s224_s1] sm:$0xff]  ;;  %v17_v1 = vld [vmem:[%s224_s1 + $0x8] sm:$0xff]  ;;  %v18_v2 = vld [vmem:[%s224_s1 + $0x10] sm:$0xff]  ;;  %135 = vmatprep.subr.bf16.mxu0 %v169_v3  ;;  %132 = vmatprep.mubr.msk.f32.mxu0 %vm170_vm0, %v171_v6 }
   0x2   :  { %v136_v4 = vpack.c.bf16 %v17_v1, %v16_v0  ;;  %v19_v5 = vld [vmem:[%s224_s1 + $0x18] sm:$0xff] }
   0x3   :  { %8 = vsyncpa [#allocation3], 0  ;;  %v139_v7 = vpack.c.bf16 %v19_v5, %v18_v2  ;;  %v15_v8 = vld [vmem:[%s223_s0] sm:$0xff]  ;;  %vm27_vm1 = vcmask 261120   ;;  %s172_s24 = smov [#allocation2]   ;;  %vm101_vm2 = vcmask 97280  }
   0x4   :  { %137 = vmatpush3.bf16.msra.mxu0 %v136_v4  ;;  %v117_v9 = vld [vmem:[%s225_s2] ss:$0 sm:$0xff]  ;;  %s109_s1 = sshll.u32 %s172_s24, 4  ;;  %s110_s1 = int_to_ptr.vmem [resolvable:$true] %s109_s1 }
   0x5   :  { %138 = vmatprep.subr.bf16.mxu0 %v169_v3  ;;  %s145_s25 = scalar_lea.vmem %s110_s1, 128  ;;  %p150_p1 = scmp.lt.s32.totalorder %s110_s1, %s110_s1 }
   0x6   :  { %p146_p0 = scmp.ne.s32.totalorder %s110_s1, %s145_s25  ;;  %p151_p2 = scmp.lt.s32.totalorder %s145_s25, %s145_s25 }
   0x8   :  { %140 = vmatpush3.bf16.msra.mxu0 %v139_v7  ;;  %p152_p3 = por %p151_p2, %p150_p1 }
   0xa   :  { %p153_p4 = pnand %p152_p3, %p146_p0 }
   0xb   :  { %133 = vmatmul.mubr.msk.f32.vlgmr.msra.gmra.mrb[0].mxu0 %vm27_vm1, %v15_v8 }
  0xde   :  { %v97_v10 = vpop.f32.mrb[0].mxu0 }
  0xdf   :  { %v98_v11 = vadd.f32 %v117_v9, %v97_v10  ;;  %v134_v12 = vpop.f32.mrb[1].mxu0 }
  0xe1   :  { %102 = vst.msk [vmem:[#allocation2] sm:$0xff] %vm101_vm2, %v98_v11 }
  0xe2   :  { %156 = shalt.err (!%p153_p4)
}
  0xe3   :  { %s157_s27 = scalar_lea.hbm %s226_s3, 128 }
  0xe4   :  { %p158_p5 = scmp.ne.s32.totalorder %s226_s3, %s157_s27  ;;  %p161_p6 = scmp.lt.u32.totalorder %s157_s27, %s226_s3 }
  0xe6   :  { %p163_p7 = pnand %p161_p6, %p158_p5 }
  0xe8   :  { %166 = shalt.err (!%p163_p7)
}
  0xe9   :  { %112 = dma.vmem_to_hbm [thread:$0]  %s110_s1, 128, %s226_s3, [#allocation3]  }
  0xea   :  { %167 = dma.done.wait [#allocation3], 128  }
  0xeb   :  { %168 = vsyncadd [#allocation3], 4294967168 }
  0xec   :  { %116 = vsyncpa [#allocation3], 1 }

</bundles_post_ra>
